<compile_context>
chip_gen: v6e
topology: v6e:2x2x1
jax: 0.10.0
libtpu: 0.0.40
codegen_flags: <defaults>
</compile_context>

<pallas_src>
import math
import functools

import jax
import jax.numpy as jnp
from jax.experimental import pallas as pl
from jax.experimental.pallas import tpu as pltpu


def _circle_points(radius, num_points):
    """Static (trace-time) enumeration of bilinear taps for each circle sample.

    Returns (points, offsets):
      points[p] = (taps, thr_scale): taps is a list of (dy, dx, weight) for the
                  non-center bilinear taps of circle point p, and thr_scale is the
                  pre-scaled threshold factor (1 - w_center) so the comparison
                  becomes  sum(w_i * neighbor_i) >= thr_scale * q   (center tap folded).
      offsets   = sorted list of distinct (dy, dx) shifted windows needed.
    """
    points = []
    offsets = set()
    for p in range(num_points):
        theta = 2.0 * math.pi * p / num_points
        rr = -radius * math.sin(theta)          # row offset (skimage convention)
        cc = radius * math.cos(theta)           # col offset
        # Canonicalize (kills sin/cos ulp asymmetry so all diagonals share exactly the
        # same folded threshold) and snap near-integer coordinates so axis-aligned
        # neighbors are single weight-1.0 taps.
        rr = round(rr, 9)
        cc = round(cc, 9)
        if abs(rr - round(rr)) < 1e-6:
            rr = float(round(rr))
        if abs(cc - round(cc)) < 1e-6:
            cc = float(round(cc))
        fy, fx = math.floor(rr), math.floor(cc)
        ty, tx = rr - fy, cc - fx
        taps = []
        thr_scale = 1.0
        for dy, dx, w in ((fy, fx, (1.0 - ty) * (1.0 - tx)),
                          (fy, fx + 1, (1.0 - ty) * tx),
                          (fy + 1, fx, ty * (1.0 - tx)),
                          (fy + 1, fx + 1, ty * tx)):
            if abs(w) < 1e-12:                  # drop zero-weight taps statically
                continue
            if dy == 0 and dx == 0:
                thr_scale -= w                  # fold the center tap into the threshold
            else:
                taps.append((int(dy), int(dx), float(w)))
                offsets.add((int(dy), int(dx)))
        points.append((taps, float(thr_scale)))
    return points, sorted(offsets)


def _lbp_kernel(x_ref, o_ref, *, H, W, radius, num_points):
    """Uniform LBP over a block of images flattened lane-dense to (tile_n, HWp).

    x_ref: (tile_n, HWp) float32 in [0, 1]   (HWp = H*W rounded up to 128 multiple)
    o_ref: (tile_n, HWp) float32
    """
    points, offsets = _circle_points(radius, num_points)
    HW = H * W
    HWp = x_ref.shape[-1]

    x = x_ref[...]                                 # (tile_n, HWp)
    q = jnp.floor(x * 255.0)                       # emulate (img*255).astype(uint8)

    # Per-pixel flattened / column index, computed in-kernel (no extra input stream).
    flat = jax.lax.broadcasted_iota(jnp.int32, (1, HWp), 1)
    if W & (W - 1) == 0:
        col = flat & (W - 1)                       # power-of-two fast path
    else:
        col = flat % W                             # (1, HWp) only; negligible cost

    # One zero-padded copy of the flattened rows; every shifted 3x3 window is a
    # static lane-slice of it (no pltpu.roll needed).
    maxk = max(abs(dy * W + dx) for dy, dx in offsets) if offsets else 0
    if maxk:
        zpad = jnp.zeros((x.shape[0], maxk), q.dtype)
        qp = jnp.concatenate([zpad, q, zpad], axis=1)
    else:
        qp = q

    def shifted_window(dy, dx):
        """window[n, f] = q[n, f + dy*W + dx] for in-image neighbors, zero outside."""
        k = dy * W + dx
        s = q if k == 0 else qp[:, maxk + k: maxk + k + HWp]
        mask = None
        # Row bounds 0 <= r + dy < H  <=>  (-dy)*W <= flat < (H - dy)*W.
        if dy < 0:
            mask = flat >= (-dy) * W
        elif dy > 0:
            mask = flat < (H - dy) * W
        # Column bounds 0 <= c + dx < W.
        if dx < 0:
            m = col >= -dx
            mask = m if mask is None else (mask & m)
        elif dx > 0:
            m = col < (W - dx)
            mask = m if mask is None else (mask & m)
        return s if mask is None else jnp.where(mask, s, 0.0)

    # Hoist the distinct shifted windows once; reused by every bilinear tap.
    win = {off: shifted_window(*off) for off in offsets}

    # Distinct thresholds: q itself for the single-tap axis-aligned neighbors, plus
    # ONE pre-scaled (1 - w00) * q shared by all diagonal samples (center tap folded).
    thr_cache = {}

    def threshold(scale):
        if scale not in thr_cache:
            thr_cache[scale] = q if scale == 1.0 else jnp.float32(scale) * q
        return thr_cache[scale]

    # Fused neighbor / transition loop: bits stay bool; ones/changes accumulate as int32.
    ones = changes = first_bit = prev_bit = None
    for p, (taps, scale) in enumerate(points):
        acc = None
        for dy, dx, w in taps:
            term = win[(dy, dx)] if w == 1.0 else jnp.float32(w) * win[(dy, dx)]
            acc = term if acc is None else acc + term
        if acc is None:
            acc = jnp.zeros_like(q)
        bit = acc >= threshold(scale)                         # bool plane
        if p == 0:
            first_bit = bit
            ones = bit.astype(jnp.int32)
            changes = jnp.zeros_like(ones)
        else:
            ones = ones + bit.astype(jnp.int32)
            changes = changes + (bit ^ prev_bit).astype(jnp.int32)
        prev_bit = bit
    changes = changes + (prev_bit ^ first_bit).astype(jnp.int32)   # wrap-around transition

    lbp = jnp.where(changes <= 2, ones, jnp.int32(num_points + 1))
    o_ref[...] = lbp.astype(jnp.float32) * jnp.float32(1.0 / 255.0)


def _choose_tiling(N, HWp, *, elem_bytes=4, target_block_bytes=1 << 20):
    """Images per grid step: ~1 MiB input blocks (compute-bound kernel, so amortize the
    ~0.35 us fixed per-step overhead; the ~12-15x live-tensor expansion of a 1 MiB
    block still fits comfortably under a 32 MiB scoped-VMEM limit on all gens incl.
    v7x's 64 MiB physical).  tile_n stays a multiple of 8 (full sublane occupancy);
    the megacore split is only forced when it does not break that (N >= 16)."""
    tile = max(1, target_block_bytes // (HWp * elem_bytes))
    tile = min(tile, N)
    if tile >= N and N >= 16:        # split for v7x's 2 TCs only when worthwhile
        tile = pl.cdiv(N, 2)
    if tile >= 8:
        tile = (tile // 8) * 8
    grid_n = pl.cdiv(N, tile)
    return tile, grid_n


def lbp_layer(x, radius=1, num_points=8):
    """Pallas implementation of LBPLayer.forward. x: (B, C, H, W) float in [0, 1]."""
    B, C, H, W = x.shape
    HW = H * W
    N = B * C
    HWp = ((HW + 127) // 128) * 128          # lane-dense trailing axis (unmasked stores)

    tile_n, grid_n = _choose_tiling(N, HWp)
    n_pad = tile_n * grid_n

    xf = x.reshape(N, HW).astype(jnp.float32)
    if n_pad != N or HWp != HW:
        xf = jnp.pad(xf, ((0, n_pad - N), (0, HWp - HW)))   # only for ragged shapes

    # TODO(synk): for very large single images (H*W*4 bytes >> ~2 MiB, e.g. 1024^2 on
    # v7x's 64 MiB VMEM), tile rows within an image with an overlapping halo (and for
    # W >= 128 switch to a (tile_n*H, W) layout so dy shifts are sublane-local).
    kern = functools.partial(
        _lbp_kernel, H=H, W=W, radius=radius, num_points=num_points
    )
    out = pl.pallas_call(
        kern,
        out_shape=jax.ShapeDtypeStruct((n_pad, HWp), jnp.float32),
        grid=(grid_n,),
        in_specs=[pl.BlockSpec((tile_n, HWp), lambda i: (i, 0))],
        out_specs=pl.BlockSpec((tile_n, HWp), lambda i: (i, 0)),
        compiler_params=pltpu.CompilerParams(
            dimension_semantics=("parallel",),
            vmem_limit_bytes=32 * 1024 * 1024,
        ),
    )(xf)

    return out[:N, :HW].reshape(B, C, H, W)


def _lbp_reference(x, radius=1, num_points=8):
    """Pure-JAX (non-Pallas) reference: explicit zero padding + static slices."""
    B, C, H, W = x.shape
    points, _ = _circle_points(radius, num_points)
    pad = int(math.ceil(radius)) + 1
    q = jnp.floor(x.astype(jnp.float32) * 255.0)
    qp = jnp.pad(q, ((0, 0), (0, 0), (pad, pad), (pad, pad)))
    bits = []
    for taps, scale in points:
        acc = None
        for dy, dx, w in taps:
            winv = qp[:, :, pad + dy:pad + dy + H, pad + dx:pad + dx + W]
            term = winv if w == 1.0 else jnp.float32(w) * winv
            acc = term if acc is None else acc + term
        if acc is None:
            acc = jnp.zeros_like(q)
        thr = q if scale == 1.0 else jnp.float32(scale) * q
        bits.append(acc >= thr)
    ones = bits[0].astype(jnp.int32)
    for b in bits[1:]:
        ones = ones + b.astype(jnp.int32)
    changes = sum((bits[p] ^ bits[(p + 1) % num_points]).astype(jnp.int32)
                  for p in range(num_points))
    lbp = jnp.where(changes <= 2, ones, jnp.int32(num_points + 1))
    return lbp.astype(jnp.float32) * jnp.float32(1.0 / 255.0)


if __name__ == "__main__":
    # LBPLayer has no learned parameters (radius / num_points / num_channels only).
    # TODO(synk): `cv2.LBP` does not exist in OpenCV; semantics follow the standard
    # uniform circular LBP with the module's uint8 quantization and /255 scaling.
    key = jax.random.PRNGKey(0)
    x = jax.random.uniform(key, (2, 4, 16, 16), dtype=jnp.float32)  # NCHW in [0, 1)

    y = jax.block_until_ready(lbp_layer(x, radius=1, num_points=8))

    assert y.shape == x.shape, y.shape
    assert y.dtype == jnp.float32

    y_ref = jax.block_until_ready(_lbp_reference(x, radius=1, num_points=8))
    assert bool(jnp.allclose(y, y_ref, atol=1e-6)), float(jnp.max(jnp.abs(y - y_ref)))
    print("KERNEL_OK")
</pallas_src>

<mosaic_0001>
module attributes {stable_mosaic.version = 11 : i64} {
  func.func @_lbp_kernel(%arg0: i32, %arg1: memref<8x256xf32, #tpu.memory_space<vmem>>, %arg2: memref<8x256xf32, #tpu.memory_space<vmem>>) attributes {dimension_semantics = [#tpu.dimension_semantics<parallel>], iteration_bounds = array<i64: 1>, scalar_prefetch = 0 : i64, scratch_operands = 0 : i64, tpu.core_type = #tpu.core_type<tc>, window_params = [{transform_indices = @transform_0, window_bounds = array<i64: 8, 256>}, {transform_indices = @transform_1, window_bounds = array<i64: 8, 256>}]} {
    %c0 = arith.constant 0 : index
    %c0_0 = arith.constant 0 : index
    %0 = vector.load %arg1[%c0, %c0_0] : memref<8x256xf32, #tpu.memory_space<vmem>>, vector<8x256xf32>
    %cst = arith.constant 2.550000e+02 : f32
    %1 = vector.broadcast %cst : f32 to vector<8x256xf32>
    %2 = arith.mulf %0, %1 : vector<8x256xf32>
    %3 = math.floor %2 : vector<8x256xf32>
    %4 = tpu.iota {dimensions = array<i32: 1>} : vector<1x256xi32>
    %c15_i32 = arith.constant 15 : i32
    %5 = vector.broadcast %c15_i32 : i32 to vector<1x256xi32>
    %6 = arith.andi %4, %5 : vector<1x256xi32>
    %cst_1 = arith.constant 0.000000e+00 : f32
    %7 = vector.broadcast %cst_1 : f32 to vector<8x17xf32>
    %8 = tpu.concatenate %7, %3, %7 in 1 : vector<8x17xf32>, vector<8x256xf32>, vector<8x17xf32> -> vector<8x290xf32>
    %9 = vector.extract_strided_slice %8 {offsets = [0, 0], sizes = [8, 256], strides = [1, 1]} : vector<8x290xf32> to vector<8x256xf32>
    %c16_i32 = arith.constant 16 : i32
    %10 = vector.broadcast %c16_i32 : i32 to vector<1x256xi32>
    %11 = arith.cmpi sge, %4, %10 : vector<1x256xi32>
    %c1_i32 = arith.constant 1 : i32
    %12 = vector.broadcast %c1_i32 : i32 to vector<1x256xi32>
    %13 = arith.cmpi sge, %6, %12 : vector<1x256xi32>
    %14 = arith.andi %11, %13 : vector<1x256xi1>
    %cst_2 = arith.constant 0.000000e+00 : f32
    %15 = vector.shape_cast %14 : vector<1x256xi1> to vector<1x256xi1>
    %16 = vector.broadcast %15 : vector<1x256xi1> to vector<8x256xi1>
    %17 = vector.broadcast %cst_2 : f32 to vector<8x256xf32>
    %18 = arith.select %16, %9, %17 : vector<8x256xi1>, vector<8x256xf32>
    %19 = vector.extract_strided_slice %8 {offsets = [0, 1], sizes = [8, 256], strides = [1, 1]} : vector<8x290xf32> to vector<8x256xf32>
    %c16_i32_3 = arith.constant 16 : i32
    %20 = vector.broadcast %c16_i32_3 : i32 to vector<1x256xi32>
    %21 = arith.cmpi sge, %4, %20 : vector<1x256xi32>
    %cst_4 = arith.constant 0.000000e+00 : f32
    %22 = vector.shape_cast %21 : vector<1x256xi1> to vector<1x256xi1>
    %23 = vector.broadcast %22 : vector<1x256xi1> to vector<8x256xi1>
    %24 = vector.broadcast %cst_4 : f32 to vector<8x256xf32>
    %25 = arith.select %23, %19, %24 : vector<8x256xi1>, vector<8x256xf32>
    %26 = vector.extract_strided_slice %8 {offsets = [0, 2], sizes = [8, 256], strides = [1, 1]} : vector<8x290xf32> to vector<8x256xf32>
    %c16_i32_5 = arith.constant 16 : i32
    %27 = vector.broadcast %c16_i32_5 : i32 to vector<1x256xi32>
    %28 = arith.cmpi sge, %4, %27 : vector<1x256xi32>
    %c15_i32_6 = arith.constant 15 : i32
    %29 = vector.broadcast %c15_i32_6 : i32 to vector<1x256xi32>
    %30 = arith.cmpi slt, %6, %29 : vector<1x256xi32>
    %31 = arith.andi %28, %30 : vector<1x256xi1>
    %cst_7 = arith.constant 0.000000e+00 : f32
    %32 = vector.shape_cast %31 : vector<1x256xi1> to vector<1x256xi1>
    %33 = vector.broadcast %32 : vector<1x256xi1> to vector<8x256xi1>
    %34 = vector.broadcast %cst_7 : f32 to vector<8x256xf32>
    %35 = arith.select %33, %26, %34 : vector<8x256xi1>, vector<8x256xf32>
    %36 = vector.extract_strided_slice %8 {offsets = [0, 16], sizes = [8, 256], strides = [1, 1]} : vector<8x290xf32> to vector<8x256xf32>
    %c1_i32_8 = arith.constant 1 : i32
    %37 = vector.broadcast %c1_i32_8 : i32 to vector<1x256xi32>
    %38 = arith.cmpi sge, %6, %37 : vector<1x256xi32>
    %cst_9 = arith.constant 0.000000e+00 : f32
    %39 = vector.shape_cast %38 : vector<1x256xi1> to vector<1x256xi1>
    %40 = vector.broadcast %39 : vector<1x256xi1> to vector<8x256xi1>
    %41 = vector.broadcast %cst_9 : f32 to vector<8x256xf32>
    %42 = arith.select %40, %36, %41 : vector<8x256xi1>, vector<8x256xf32>
    %43 = vector.extract_strided_slice %8 {offsets = [0, 18], sizes = [8, 256], strides = [1, 1]} : vector<8x290xf32> to vector<8x256xf32>
    %c15_i32_10 = arith.constant 15 : i32
    %44 = vector.broadcast %c15_i32_10 : i32 to vector<1x256xi32>
    %45 = arith.cmpi slt, %6, %44 : vector<1x256xi32>
    %cst_11 = arith.constant 0.000000e+00 : f32
    %46 = vector.shape_cast %45 : vector<1x256xi1> to vector<1x256xi1>
    %47 = vector.broadcast %46 : vector<1x256xi1> to vector<8x256xi1>
    %48 = vector.broadcast %cst_11 : f32 to vector<8x256xf32>
    %49 = arith.select %47, %43, %48 : vector<8x256xi1>, vector<8x256xf32>
    %50 = vector.extract_strided_slice %8 {offsets = [0, 32], sizes = [8, 256], strides = [1, 1]} : vector<8x290xf32> to vector<8x256xf32>
    %c240_i32 = arith.constant 240 : i32
    %51 = vector.broadcast %c240_i32 : i32 to vector<1x256xi32>
    %52 = arith.cmpi slt, %4, %51 : vector<1x256xi32>
    %c1_i32_12 = arith.constant 1 : i32
    %53 = vector.broadcast %c1_i32_12 : i32 to vector<1x256xi32>
    %54 = arith.cmpi sge, %6, %53 : vector<1x256xi32>
    %55 = arith.andi %52, %54 : vector<1x256xi1>
    %cst_13 = arith.constant 0.000000e+00 : f32
    %56 = vector.shape_cast %55 : vector<1x256xi1> to vector<1x256xi1>
    %57 = vector.broadcast %56 : vector<1x256xi1> to vector<8x256xi1>
    %58 = vector.broadcast %cst_13 : f32 to vector<8x256xf32>
    %59 = arith.select %57, %50, %58 : vector<8x256xi1>, vector<8x256xf32>
    %60 = vector.extract_strided_slice %8 {offsets = [0, 33], sizes = [8, 256], strides = [1, 1]} : vector<8x290xf32> to vector<8x256xf32>
    %c240_i32_14 = arith.constant 240 : i32
    %61 = vector.broadcast %c240_i32_14 : i32 to vector<1x256xi32>
    %62 = arith.cmpi slt, %4, %61 : vector<1x256xi32>
    %cst_15 = arith.constant 0.000000e+00 : f32
    %63 = vector.shape_cast %62 : vector<1x256xi1> to vector<1x256xi1>
    %64 = vector.broadcast %63 : vector<1x256xi1> to vector<8x256xi1>
    %65 = vector.broadcast %cst_15 : f32 to vector<8x256xf32>
    %66 = arith.select %64, %60, %65 : vector<8x256xi1>, vector<8x256xf32>
    %67 = vector.extract_strided_slice %8 {offsets = [0, 34], sizes = [8, 256], strides = [1, 1]} : vector<8x290xf32> to vector<8x256xf32>
    %c240_i32_16 = arith.constant 240 : i32
    %68 = vector.broadcast %c240_i32_16 : i32 to vector<1x256xi32>
    %69 = arith.cmpi slt, %4, %68 : vector<1x256xi32>
    %c15_i32_17 = arith.constant 15 : i32
    %70 = vector.broadcast %c15_i32_17 : i32 to vector<1x256xi32>
    %71 = arith.cmpi slt, %6, %70 : vector<1x256xi32>
    %72 = arith.andi %69, %71 : vector<1x256xi1>
    %cst_18 = arith.constant 0.000000e+00 : f32
    %73 = vector.shape_cast %72 : vector<1x256xi1> to vector<1x256xi1>
    %74 = vector.broadcast %73 : vector<1x256xi1> to vector<8x256xi1>
    %75 = vector.broadcast %cst_18 : f32 to vector<8x256xf32>
    %76 = arith.select %74, %67, %75 : vector<8x256xi1>, vector<8x256xf32>
    %77 = arith.cmpf oge, %49, %3 : vector<8x256xf32>
    %78 = arith.extui %77 : vector<8x256xi1> to vector<8x256xi32>
    %c0_i32 = arith.constant 0 : i32
    %79 = vector.broadcast %c0_i32 : i32 to vector<8x256xi32>
    %cst_19 = arith.constant 0.207106784 : f32
    %80 = vector.broadcast %cst_19 : f32 to vector<8x256xf32>
    %81 = arith.mulf %80, %25 : vector<8x256xf32>
    %cst_20 = arith.constant 5.000000e-01 : f32
    %82 = vector.broadcast %cst_20 : f32 to vector<8x256xf32>
    %83 = arith.mulf %82, %35 : vector<8x256xf32>
    %84 = arith.addf %81, %83 : vector<8x256xf32>
    %cst_21 = arith.constant 0.207106784 : f32
    %85 = vector.broadcast %cst_21 : f32 to vector<8x256xf32>
    %86 = arith.mulf %85, %49 : vector<8x256xf32>
    %87 = arith.addf %84, %86 : vector<8x256xf32>
    %cst_22 = arith.constant 0.914213538 : f32
    %88 = vector.broadcast %cst_22 : f32 to vector<8x256xf32>
    %89 = arith.mulf %88, %3 : vector<8x256xf32>
    %90 = arith.cmpf oge, %87, %89 : vector<8x256xf32>
    %91 = arith.extui %90 : vector<8x256xi1> to vector<8x256xi32>
    %92 = arith.addi %78, %91 : vector<8x256xi32>
    %93 = arith.xori %90, %77 : vector<8x256xi1>
    %94 = arith.extui %93 : vector<8x256xi1> to vector<8x256xi32>
    %95 = arith.addi %79, %94 : vector<8x256xi32>
    %96 = arith.cmpf oge, %25, %3 : vector<8x256xf32>
    %97 = arith.extui %96 : vector<8x256xi1> to vector<8x256xi32>
    %98 = arith.addi %92, %97 : vector<8x256xi32>
    %99 = arith.xori %96, %90 : vector<8x256xi1>
    %100 = arith.extui %99 : vector<8x256xi1> to vector<8x256xi32>
    %101 = arith.addi %95, %100 : vector<8x256xi32>
    %cst_23 = arith.constant 5.000000e-01 : f32
    %102 = vector.broadcast %cst_23 : f32 to vector<8x256xf32>
    %103 = arith.mulf %102, %18 : vector<8x256xf32>
    %cst_24 = arith.constant 0.207106784 : f32
    %104 = vector.broadcast %cst_24 : f32 to vector<8x256xf32>
    %105 = arith.mulf %104, %25 : vector<8x256xf32>
    %106 = arith.addf %103, %105 : vector<8x256xf32>
    %cst_25 = arith.constant 0.207106784 : f32
    %107 = vector.broadcast %cst_25 : f32 to vector<8x256xf32>
    %108 = arith.mulf %107, %42 : vector<8x256xf32>
    %109 = arith.addf %106, %108 : vector<8x256xf32>
    %110 = arith.cmpf oge, %109, %89 : vector<8x256xf32>
    %111 = arith.extui %110 : vector<8x256xi1> to vector<8x256xi32>
    %112 = arith.addi %98, %111 : vector<8x256xi32>
    %113 = arith.xori %110, %96 : vector<8x256xi1>
    %114 = arith.extui %113 : vector<8x256xi1> to vector<8x256xi32>
    %115 = arith.addi %101, %114 : vector<8x256xi32>
    %116 = arith.cmpf oge, %42, %3 : vector<8x256xf32>
    %117 = arith.extui %116 : vector<8x256xi1> to vector<8x256xi32>
    %118 = arith.addi %112, %117 : vector<8x256xi32>
    %119 = arith.xori %116, %110 : vector<8x256xi1>
    %120 = arith.extui %119 : vector<8x256xi1> to vector<8x256xi32>
    %121 = arith.addi %115, %120 : vector<8x256xi32>
    %cst_26 = arith.constant 0.207106784 : f32
    %122 = vector.broadcast %cst_26 : f32 to vector<8x256xf32>
    %123 = arith.mulf %122, %42 : vector<8x256xf32>
    %cst_27 = arith.constant 5.000000e-01 : f32
    %124 = vector.broadcast %cst_27 : f32 to vector<8x256xf32>
    %125 = arith.mulf %124, %59 : vector<8x256xf32>
    %126 = arith.addf %123, %125 : vector<8x256xf32>
    %cst_28 = arith.constant 0.207106784 : f32
    %127 = vector.broadcast %cst_28 : f32 to vector<8x256xf32>
    %128 = arith.mulf %127, %66 : vector<8x256xf32>
    %129 = arith.addf %126, %128 : vector<8x256xf32>
    %130 = arith.cmpf oge, %129, %89 : vector<8x256xf32>
    %131 = arith.extui %130 : vector<8x256xi1> to vector<8x256xi32>
    %132 = arith.addi %118, %131 : vector<8x256xi32>
    %133 = arith.xori %130, %116 : vector<8x256xi1>
    %134 = arith.extui %133 : vector<8x256xi1> to vector<8x256xi32>
    %135 = arith.addi %121, %134 : vector<8x256xi32>
    %136 = arith.cmpf oge, %66, %3 : vector<8x256xf32>
    %137 = arith.extui %136 : vector<8x256xi1> to vector<8x256xi32>
    %138 = arith.addi %132, %137 : vector<8x256xi32>
    %139 = arith.xori %136, %130 : vector<8x256xi1>
    %140 = arith.extui %139 : vector<8x256xi1> to vector<8x256xi32>
    %141 = arith.addi %135, %140 : vector<8x256xi32>
    %cst_29 = arith.constant 0.207106784 : f32
    %142 = vector.broadcast %cst_29 : f32 to vector<8x256xf32>
    %143 = arith.mulf %142, %49 : vector<8x256xf32>
    %cst_30 = arith.constant 0.207106784 : f32
    %144 = vector.broadcast %cst_30 : f32 to vector<8x256xf32>
    %145 = arith.mulf %144, %66 : vector<8x256xf32>
    %146 = arith.addf %143, %145 : vector<8x256xf32>
    %cst_31 = arith.constant 5.000000e-01 : f32
    %147 = vector.broadcast %cst_31 : f32 to vector<8x256xf32>
    %148 = arith.mulf %147, %76 : vector<8x256xf32>
    %149 = arith.addf %146, %148 : vector<8x256xf32>
    %150 = arith.cmpf oge, %149, %89 : vector<8x256xf32>
    %151 = arith.extui %150 : vector<8x256xi1> to vector<8x256xi32>
    %152 = arith.addi %138, %151 : vector<8x256xi32>
    %153 = arith.xori %150, %136 : vector<8x256xi1>
    %154 = arith.extui %153 : vector<8x256xi1> to vector<8x256xi32>
    %155 = arith.addi %141, %154 : vector<8x256xi32>
    %156 = arith.xori %150, %77 : vector<8x256xi1>
    %157 = arith.extui %156 : vector<8x256xi1> to vector<8x256xi32>
    %158 = arith.addi %155, %157 : vector<8x256xi32>
    %c2_i32 = arith.constant 2 : i32
    %159 = vector.broadcast %c2_i32 : i32 to vector<8x256xi32>
    %160 = arith.cmpi sle, %158, %159 : vector<8x256xi32>
    %c9_i32 = arith.constant 9 : i32
    %161 = vector.broadcast %c9_i32 : i32 to vector<8x256xi32>
    %162 = arith.select %160, %152, %161 : vector<8x256xi1>, vector<8x256xi32>
    %163 = arith.sitofp %162 : vector<8x256xi32> to vector<8x256xf32>
    %cst_32 = arith.constant 0.00392156886 : f32
    %164 = vector.broadcast %cst_32 : f32 to vector<8x256xf32>
    %165 = arith.mulf %163, %164 : vector<8x256xf32>
    %c0_33 = arith.constant 0 : index
    %c0_34 = arith.constant 0 : index
    %166 = vector.load %arg2[%c0_33, %c0_34] : memref<8x256xf32, #tpu.memory_space<vmem>>, vector<8x256xf32>
    tpu.vector_store %arg2[%c0_33, %c0_34], %165 {strides = array<i32>} : memref<8x256xf32, #tpu.memory_space<vmem>>, vector<8x256xf32>,
    return
  }
  func.func @transform_0(%arg0: i32) -> (i32, i32) {
    %c0_i32 = arith.constant 0 : i32
    %c0_i32_0 = arith.constant 0 : i32
    return %arg0, %c0_i32 : i32, i32
  }
  func.func @transform_1(%arg0: i32) -> (i32, i32) {
    %c0_i32 = arith.constant 0 : i32
    %c0_i32_0 = arith.constant 0 : i32
    return %arg0, %c0_i32 : i32, i32
  }
}

</mosaic_0001>

<bundles_post_ra>
// kernel: tpu_custom_call.1
= control target key start
LH: loop header
LB: loop body
LE: loop exit
PB: predicated region body
PF: predicated region fallthrough
CT: control target
= control target key end

     0   :  { %6 = vsyncpa [#allocation3], 0  ;;  %s725_s0 = inlined_call_operand.hbm [shape: f32[8,256], index: 0, kind: input, shape index: {}]   ;;  %s726_s1 = inlined_call_operand.hbm [shape: f32[8,256], index: 1, kind: output, shape index: {}]  }
   0x1   :  { %7 = vsyncpa [#allocation4], 0  ;;  %s394_s6 = smov [#allocation2]  }
   0x2   :  { %s14_s7 = sshll.u32 %s394_s6, 4  ;;  %s15_s7 = int_to_ptr.vmem [resolvable:$true] %s14_s7 }
   0x3   :  { %s358_s8 = scalar_lea.vmem %s15_s7, 256  ;;  %p363_p1 = scmp.lt.s32.totalorder %s15_s7, %s15_s7 }
   0x4   :  { %p359_p0 = scmp.ne.s32.totalorder %s15_s7, %s358_s8  ;;  %p364_p2 = scmp.lt.s32.totalorder %s358_s8, %s358_s8 }
   0x6   :  { %p365_p3 = por %p364_p2, %p363_p1 }
   0x8   :  { %p366_p4 = pnand %p365_p3, %p359_p0 }
   0xa   :  { %369 = shalt.err (!%p366_p4)
}
   0xb   :  { %17 = dma.hbm_to_vmem [thread:$0]  %s725_s0, 256, %s15_s7, [#allocation3]  }
   0xc   :  { %390 = dma.done.wait [#allocation3], 256  }
   0xd   :  { %391 = vsyncadd [#allocation3], 4294967040  ;;  %v21_v0 = vld [vmem:[#allocation2] sm:$0xff]  ;;  %v22_v1 = vld [vmem:[#allocation2 + $0x8] sm:$0xff]  ;;  %s395_s11 = smov 17   ;;  %vm38_vm0 = vcmask 138240   ;;  %v27_v11 = vlaneseq }
   0xe   :  { %v23_v2 = vmul.f32 255.0, %v21_v0  ;;  %v24_v3 = vmul.f32 255.0, %v22_v1  ;;  %s396_s0 = smov 126   ;;  %s397_s12 = smov 127   ;;  %vm90_vm2 = vcmask 1031168   ;;  %vm69_vm4 = vcmask 1039360  }
   0xf   :  { %s398_s13 = smov 110   ;;  %s399_s14 = smov 112   ;;  %v28_v14 = vand.u32 127, %v27_v11  ;;  %vm124_vm9 = vcmask 900096   ;;  %vm107_vm10 = vcmask 916480   ;;  %v403_v63 = vmov 0  }
  0x10   :  { %v418_v4 = vfloor.f32 %v23_v2  ;;  %v421_v5 = vfloor.f32 %v24_v3  ;;  %s400_s15 = smov 96   ;;  %s401_s16 = smov 95  }
  0x11   :  { %s402_s17 = smov 94   ;;  %v30_v17 = vand.u32 15, %v28_v14  ;;  %v442_v18 = vadd.s32 128, %v28_v14  ;;  %vm45_vm3 = vcmp.ge.s32.totalorder %v28_v14, 16  ;;  %s404_s18 = smov [#allocation5]  }
  0x12   :  { %34 = vrot.lane.b32.xlu0 %v418_v4, %s395_s11  ;;  %v488_v46 = vmul.f32 0.91421354, %v418_v4  ;;  %v501_v55 = vmul.f32 0.91421354, %v421_v5  ;;  %s330_s19 = sshll.u32 %s404_s18, 4  ;;  %s331_s19 = int_to_ptr.vmem [resolvable:$true] %s330_s19 }
  0x13   :  { %vm444_vm1 = vcmp.lt.s32.totalorder %v30_v17, 15  ;;  %v31_v22 = vand.u32 15, %v442_v18  ;;  %vm452_vm6 = vcmp.ge.s32.totalorder %v30_v17, 1  ;;  %vm728_vm12 = vcmp.lt.s32.totalorder %v442_v18, 240  ;;  %s370_s20 = scalar_lea.vmem %s331_s19, 256  ;;  %p375_p6 = scmp.lt.s32.totalorder %s331_s19, %s331_s19 }
  0x14   :  { %vm78_vm5 = vmand %vm45_vm3, %vm444_vm1  ;;  %p371_p5 = scmp.ne.s32.totalorder %s331_s19, %s370_s20  ;;  %p376_p7 = scmp.lt.s32.totalorder %s370_s20, %s370_s20 }
  0x15   :  { %vm456_vm7 = vcmp.lt.s32.totalorder %v31_v22, 15  ;;  %vm465_vm8 = vmand %vm45_vm3, %vm452_vm6  ;;  %vm496_vm11 = vcmp.ge.s32.totalorder %v31_v22, 1 }
  0x16   :  { %36 = vrot.lane.b32.xlu0 %v421_v5, %s395_s11  ;;  %p377_p8 = por %p376_p7, %p375_p6 }
  0x18   :  { %p378_p9 = pnand %p377_p8, %p371_p5 }
  0x84   :  { %v35_v6 = vpop.permute.xlu0 %34 }
  0x85   :  { %v424_v7 = vsel %vm38_vm0, 0.0, %v35_v6 }
  0x86   :  { %84 = vrot.lane.b32.xlu0 %v424_v7, %s396_s0  ;;  %63 = vrot.lane.b32.xlu1 %v424_v7, %s397_s12  ;;  %v55_v39 = vsel %vm465_vm8, %v424_v7, 0.0 }
  0x87   :  { %v226_v52 = vmul.f32 0.5, %v55_v39 }
  0x88   :  { %v37_v8 = vpop.permute.xlu0 %36 }
  0x89   :  { %v428_v9 = vsel %vm38_vm0, %v35_v6, %v37_v8  ;;  %v44_v10 = vsel %vm38_vm0, %v37_v8, 0.0 }
  0x8a   :  { %88 = vrot.lane.b32.xlu0 %v44_v10, %s396_s0  ;;  %65 = vrot.lane.b32.xlu1 %v428_v9, %s397_s12  ;;  %v56_v62 = vsel %vm496_vm11, %v428_v9, 0.0 }
  0x8e   :  { %118 = vrot.lane.b32.xlu0 %v424_v7, %s398_s13  ;;  %86 = vrot.lane.b32.xlu1 %v428_v9, %s396_s0 }
  0x92   :  { %122 = vrot.lane.b32.xlu0 %v44_v10, %s398_s13  ;;  %67 = vrot.lane.b32.xlu1 %v44_v10, %s397_s12 }
  0x96   :  { %103 = vrot.lane.b32.xlu0 %v428_v9, %s399_s14  ;;  %120 = vrot.lane.b32.xlu1 %v428_v9, %s398_s13 }
  0x9a   :  { %139 = vrot.lane.b32.xlu0 %v424_v7, %s400_s15  ;;  %101 = vrot.lane.b32.xlu1 %v424_v7, %s399_s14 }
  0x9e   :  { %143 = vrot.lane.b32.xlu0 %v44_v10, %s400_s15  ;;  %105 = vrot.lane.b32.xlu1 %v44_v10, %s399_s14 }
  0xa2   :  { %160 = vrot.lane.b32.xlu0 %v44_v10, %s401_s16  ;;  %141 = vrot.lane.b32.xlu1 %v428_v9, %s400_s15 }
  0xa6   :  { %175 = vrot.lane.b32.xlu0 %v424_v7, %s402_s17  ;;  %158 = vrot.lane.b32.xlu1 %v428_v9, %s401_s16 }
  0xaa   :  { %179 = vrot.lane.b32.xlu0 %v44_v10, %s402_s17  ;;  %156 = vrot.lane.b32.xlu1 %v424_v7, %s401_s16 }
  0xae   :  { %177 = vrot.lane.b32.xlu1 %v428_v9, %s402_s17  ;;  %v227_v9 = vmul.f32 0.5, %v56_v62 }
  0xf8   :  { %v64_v12 = vpop.permute.xlu1 %63  ;;  %v85_v13 = vpop.permute.xlu0 %84 }
  0xfc   :  { %v66_v15 = vpop.permute.xlu1 %65  ;;  %v89_v16 = vpop.permute.xlu0 %88 }
  0xfd   :  { %v70_v25 = vsel %vm69_vm4, %v64_v12, %v66_v15 }
  0xfe   :  { %v470_v33 = vsel %vm45_vm3, %v70_v25, 0.0 }
  0xff   :  { %v192_v40 = vmul.f32 0.20710678, %v470_v33  ;;  %vm214_vm0 = vcmp.ge.f32.partialorder %v470_v33, %v418_v4 }
 0x100   :  { %v87_v20 = vpop.permute.xlu1 %86  ;;  %v119_v21 = vpop.permute.xlu0 %118 }
 0x101   :  { %v91_v23 = vsel %vm90_vm2, %v85_v13, %v87_v20  ;;  %v92_v27 = vsel %vm90_vm2, %v87_v20, %v89_v16  ;;  %v228_v60 = vadd.f32 %v226_v52, %v192_v40  ;;  %vm536_vm2 = vmand %vm728_vm12, %vm496_vm11 }
 0x102   :  { %v95_v28 = vsel %vm78_vm5, %v91_v23, 0.0  ;;  %v96_v34 = vsel %vm456_vm7, %v92_v27, 0.0  ;;  %vm145_vm5 = vcmask 785408  }
 0x103   :  { %v194_v35 = vmul.f32 0.5, %v95_v28  ;;  %v195_v41 = vmul.f32 0.5, %v96_v34 }
 0x104   :  { %v68_v29 = vpop.permute.xlu1 %67  ;;  %v123_v30 = vpop.permute.xlu0 %122 }
 0x105   :  { %v460_v31 = vsel %vm69_vm4, %v66_v15, %v68_v29  ;;  %v196_v47 = vadd.f32 %v194_v35, %v192_v40  ;;  %v216_v15 = vsel %vm214_vm0, 1, %v403_v63 }
 0x106   :  { %v193_v36 = vmul.f32 0.20710678, %v460_v31 }
 0x108   :  { %v121_v37 = vpop.permute.xlu1 %120  ;;  %v104_v38 = vpop.permute.xlu0 %103  ;;  %v197_v48 = vadd.f32 %v195_v41, %v193_v36  ;;  %v229_v16 = vadd.f32 %v227_v9, %v193_v36 }
 0x109   :  { %v125_v42 = vsel %vm124_vm9, %v119_v21, %v121_v37  ;;  %v126_v43 = vsel %vm124_vm9, %v121_v37, %v123_v30 }
 0x10a   :  { %v481_v44 = vsel %vm444_vm1, %v125_v42, 0.0  ;;  %v485_v45 = vsel %vm456_vm7, %v126_v43, 0.0 }
 0x10b   :  { %v491_v49 = vmul.f32 0.20710678, %v481_v44  ;;  %v494_v50 = vmul.f32 0.20710678, %v485_v45  ;;  %vm727_vm13 = vcmp.ge.f32.partialorder %v481_v44, %v418_v4  ;;  %vm729_vm3 = vcmp.ge.f32.partialorder %v485_v45, %v421_v5 }
 0x10c   :  { %v102_v53 = vpop.permute.xlu1 %101  ;;  %v140_v54 = vpop.permute.xlu0 %139  ;;  %v190_v6 = vsel %vm727_vm13, 1, %v403_v63 }
 0x10d   :  { %v200_v56 = vadd.f32 %v491_v49, %v196_v47  ;;  %v201_v57 = vadd.f32 %v494_v50, %v197_v48  ;;  %v108_v58 = vsel %vm107_vm10, %v102_v53, %v104_v38 }
 0x10e   :  { %v508_v59 = vsel %vm452_vm6, %v108_v58, 0.0 }
 0x10f   :  { %vm204_vm14 = vcmp.ge.f32.partialorder %v200_v56, %v488_v46  ;;  %v515_v61 = vmul.f32 0.20710678, %v508_v59  ;;  %vm205_vm15 = vcmp.ge.f32.partialorder %v201_v57, %v501_v55 }
 0x110   :  { %v206_v0 = vsel %vm204_vm14, 1, %v403_v63  ;;  %v106_v1 = vpop.permute.xlu1 %105  ;;  %v144_v2 = vpop.permute.xlu0 %143  ;;  %vm210_vm4 = vmxor %vm204_vm14, %vm727_vm13  ;;  %vm215_vm13 = vcmp.ge.f32.partialorder %v460_v31, %v421_v5  ;;  %v207_v20 = vsel %vm205_vm15, 1, %v403_v63 }
 0x111   :  { %v232_v3 = vadd.f32 %v515_v61, %v228_v60  ;;  %v109_v7 = vsel %vm107_vm10, %v104_v38, %v106_v1  ;;  %v208_v10 = vadd.s32 %v206_v0, %v190_v6  ;;  %vm552_vm8 = vmxor %vm205_vm15, %vm729_vm3  ;;  %vm162_vm10 = vcmask 777216  }
 0x112   :  { %v559_v12 = vsel %vm496_vm11, %v109_v7, 0.0  ;;  %vm220_vm12 = vmxor %vm214_vm0, %vm204_vm14  ;;  %v212_v21 = vsel %vm210_vm4, 1, %v403_v63  ;;  %vm246_vm3 = vcmp.ge.f32.partialorder %v508_v59, %v418_v4  ;;  %vm181_vm14 = vcmask 769024  }
 0x113   :  { %vm234_vm9 = vcmp.ge.f32.partialorder %v232_v3, %v488_v46  ;;  %v231_v17 = vmul.f32 0.20710678, %v559_v12  ;;  %vm221_vm11 = vmxor %vm215_vm13, %vm205_vm15  ;;  %v213_v23 = vsel %vm552_vm8, 1, %v403_v63  ;;  %v218_v25 = vadd.s32 %v216_v15, %v208_v10 }
 0x114   :  { %v142_v13 = vpop.permute.xlu1 %141  ;;  %v161_v14 = vpop.permute.xlu0 %160  ;;  %vm240_vm4 = vmxor %vm234_vm9, %vm214_vm0  ;;  %v222_v29 = vsel %vm220_vm12, 1, %v403_v63  ;;  %v236_v30 = vsel %vm234_vm9, 1, %v403_v63  ;;  %v223_v33 = vsel %vm221_vm11, 1, %v403_v63  ;;  %vm744_vm12 = vcmp.ge.f32.partialorder %v485_v45, %v421_v5 }
 0x115   :  { %v146_v22 = vsel %vm145_vm5, %v140_v54, %v142_v13  ;;  %v233_v27 = vadd.f32 %v231_v17, %v229_v16  ;;  %v147_v28 = vsel %vm145_vm5, %v142_v13, %v144_v2  ;;  %v191_v38 = vsel %vm744_vm12, 1, %v403_v63 }
 0x116   :  { %v150_v32 = vsel %vm452_vm6, %v146_v22, 0.0  ;;  %v151_v34 = vsel %vm536_vm2, %v147_v28, 0.0  ;;  %v242_v39 = vsel %vm240_vm4, 1, %v403_v63  ;;  %vm745_vm0 = vcmp.lt.s32.totalorder %v442_v18, 240  ;;  %vm252_vm2 = vmxor %vm246_vm3, %vm234_vm9 }
 0x117   :  { %vm235_vm15 = vcmp.ge.f32.partialorder %v233_v27, %v501_v55  ;;  %v259_v36 = vmul.f32 0.5, %v151_v34  ;;  %v258_v24 = vmul.f32 0.5, %v150_v32  ;;  %v217_v42 = vsel %vm215_vm13, 1, %v403_v63  ;;  %vm746_vm9 = vmmov %vm745_vm0 }
 0x118   :  { %v159_v35 = vpop.permute.xlu1 %158  ;;  %vm241_vm6 = vmxor %vm235_vm15, %vm215_vm13  ;;  %v176_v41 = vpop.permute.xlu0 %175  ;;  %v209_v43 = vadd.s32 %v207_v20, %v191_v38  ;;  %v224_v47 = vadd.s32 %v222_v29, %v212_v21  ;;  %v238_v48 = vadd.s32 %v236_v30, %v218_v25  ;;  %v225_v51 = vadd.s32 %v223_v33, %v213_v23 }
 0x119   :  { %v164_v37 = vsel %vm162_vm10, %v159_v35, %v161_v14  ;;  %v248_v52 = vsel %vm246_vm3, 1, %v403_v63  ;;  %v261_v53 = vadd.f32 %v259_v36, %v231_v17  ;;  %v243_v57 = vsel %vm241_vm6, 1, %v403_v63 }
 0x11a   :  { %v617_v40 = vsel %vm745_vm0, %v164_v37, 0.0  ;;  %v244_v56 = vadd.s32 %v242_v39, %v224_v47  ;;  %vm247_vm13 = vcmp.ge.f32.partialorder %v559_v12, %v421_v5  ;;  %v237_v60 = vsel %vm235_vm15, 1, %v403_v63 }
 0x11b   :  { %v263_v54 = vmul.f32 0.20710678, %v617_v40  ;;  %v260_v62 = vadd.f32 %v258_v24, %v515_v61  ;;  %v219_v2 = vadd.s32 %v217_v42, %v209_v43  ;;  %v250_v3 = vadd.s32 %v248_v52, %v238_v48  ;;  %vm253_vm5 = vmxor %vm247_vm13, %vm235_vm15 }
 0x11c   :  { %v157_v31 = vpop.permute.xlu1 %156  ;;  %v254_v6 = vsel %vm252_vm2, 1, %v403_v63  ;;  %v245_v7 = vadd.s32 %v243_v57, %v225_v51  ;;  %v249_v8 = vsel %vm247_vm13, 1, %v403_v63  ;;  %v180_v9 = vpop.permute.xlu0 %179  ;;  %v255_v26 = vsel %vm253_vm5, 1, %v403_v63 }
 0x11d   :  { %v163_v58 = vsel %vm162_vm10, %v157_v31, %v159_v35  ;;  %v265_v0 = vadd.f32 %v263_v54, %v261_v53  ;;  %vm656_vm10 = vmand %vm746_vm9, %vm456_vm7  ;;  %v256_v13 = vadd.s32 %v254_v6, %v244_v56  ;;  %v239_v14 = vadd.s32 %v237_v60, %v219_v2 }
 0x11e   :  { %v262_v1 = vmul.f32 0.20710678, %v163_v58  ;;  %vm279_vm7 = vcmp.ge.f32.partialorder %v617_v40, %v421_v5  ;;  %v257_v21 = vadd.s32 %v255_v26, %v245_v7  ;;  %v291_v59 = vadd.f32 %v263_v54, %v494_v50 }
 0x11f   :  { %vm267_vm8 = vcmp.ge.f32.partialorder %v265_v0, %v501_v55  ;;  %v251_v34 = vadd.s32 %v249_v8, %v239_v14  ;;  %v281_v42 = vsel %vm279_vm7, 1, %v403_v63 }
 0x120   :  { %v264_v61 = vadd.f32 %v262_v1, %v260_v62  ;;  %v178_v11 = vpop.permute.xlu1 %177  ;;  %vm273_vm11 = vmxor %vm267_vm8, %vm247_vm13  ;;  %v290_v19 = vadd.f32 %v262_v1, %v491_v49  ;;  %v269_v25 = vsel %vm267_vm8, 1, %v403_v63  ;;  %vm749_vm13 = vcmp.ge.f32.partialorder %v481_v44, %v418_v4 }
 0x121   :  { %v182_v15 = vsel %vm181_vm14, %v176_v41, %v178_v11  ;;  %v183_v16 = vsel %vm181_vm14, %v178_v11, %v180_v9  ;;  %v275_v17 = vsel %vm273_vm11, 1, %v403_v63  ;;  %vm278_vm14 = vcmp.ge.f32.partialorder %v163_v58, %v418_v4 }
 0x122   :  { %vm266_vm4 = vcmp.ge.f32.partialorder %v264_v61, %v488_v46  ;;  %v186_v18 = vsel %vm444_vm1, %v182_v15, 0.0  ;;  %v187_v20 = vsel %vm656_vm10, %v183_v16, 0.0  ;;  %v277_v29 = vadd.s32 %v275_v17, %v257_v21  ;;  %vm285_vm1 = vmxor %vm279_vm7, %vm267_vm8 }
 0x123   :  { %v268_v12 = vsel %vm266_vm4, 1, %v403_v63  ;;  %vm272_vm15 = vmxor %vm266_vm4, %vm246_vm3  ;;  %v292_v23 = vmul.f32 0.5, %v186_v18  ;;  %v293_v28 = vmul.f32 0.5, %v187_v20  ;;  %v271_v36 = vadd.s32 %v269_v25, %v251_v34 }
 0x124   :  { %v274_v22 = vsel %vm272_vm15, 1, %v403_v63  ;;  %vm284_vm12 = vmxor %vm278_vm14, %vm266_vm4  ;;  %v270_v30 = vadd.s32 %v268_v12, %v250_v3  ;;  %v287_v50 = vsel %vm285_vm1, 1, %v403_v63  ;;  %v280_v37 = vsel %vm278_vm14, 1, %v403_v63 }
 0x125   :  { %v276_v27 = vadd.s32 %v274_v22, %v256_v13  ;;  %v286_v32 = vsel %vm284_vm12, 1, %v403_v63  ;;  %v294_v49 = vadd.f32 %v292_v23, %v290_v19  ;;  %v295_v33 = vadd.f32 %v293_v28, %v291_v59 }
 0x126   :  { %v289_v38 = vadd.s32 %v287_v50, %v277_v29  ;;  %v282_v39 = vadd.s32 %v280_v37, %v270_v30  ;;  %vm750_vm8 = vcmp.ge.f32.partialorder %v485_v45, %v421_v5  ;;  %v283_v51 = vadd.s32 %v281_v42, %v271_v36 }
 0x127   :  { %v288_v35 = vadd.s32 %v286_v32, %v276_v27  ;;  %vm296_vm3 = vcmp.ge.f32.partialorder %v294_v49, %v488_v46  ;;  %vm297_vm6 = vcmp.ge.f32.partialorder %v295_v33, %v501_v55 }
 0x128   :  { %vm302_vm0 = vmxor %vm296_vm3, %vm278_vm14  ;;  %v298_v41 = vsel %vm296_vm3, 1, %v403_v63  ;;  %v299_v43 = vsel %vm297_vm6, 1, %v403_v63 }
 0x129   :  { %vm303_vm2 = vmxor %vm297_vm6, %vm279_vm7  ;;  %v304_v46 = vsel %vm302_vm0, 1, %v403_v63  ;;  %v300_v52 = vadd.s32 %v298_v41, %v282_v39  ;;  %v301_v54 = vadd.s32 %v299_v43, %v283_v51 }
 0x12a   :  { %v305_v24 = vsel %vm303_vm2, 1, %v403_v63  ;;  %vm308_vm5 = vmxor %vm296_vm3, %vm749_vm13  ;;  %v306_v55 = vadd.s32 %v304_v46, %v288_v35 }
 0x12b   :  { %vm309_vm9 = vmxor %vm297_vm6, %vm750_vm8  ;;  %v307_v47 = vadd.s32 %v305_v24, %v289_v38  ;;  %v310_v48 = vsel %vm308_vm5, 1, %v403_v63 }
 0x12c   :  { %v311_v4 = vsel %vm309_vm9, 1, %v403_v63  ;;  %v312_v44 = vadd.s32 %v310_v48, %v306_v55 }
 0x12d   :  { %v313_v53 = vadd.s32 %v311_v4, %v307_v47 }
 0x12e   :  { %vm314_vm10 = vcmp.le.s32.totalorder %v312_v44, 2 }
 0x12f   :  { %vm315_vm11 = vcmp.le.s32.totalorder %v313_v53, 2  ;;  %v316_v40 = vsel %vm314_vm10, %v300_v52, 9 }
 0x130   :  { %v317_v31 = vsel %vm315_vm11, %v301_v54, 9  ;;  %v318_v56 = vcvt.s32.f32 %v316_v40 }
 0x131   :  { %v319_v5 = vcvt.s32.f32 %v317_v31 }
 0x132   :  { %v320_v45 = vmul.f32 0.003921569, %v318_v56 }
 0x133   :  { %v321_v57 = vmul.f32 0.003921569, %v319_v5 }
 0x134   :  { %322 = vst [vmem:[#allocation5] sm:$0xff] %v320_v45 }
 0x135   :  { %323 = vst [vmem:[#allocation5 + $0x8] sm:$0xff] %v321_v57 }
 0x136   :  { %381 = shalt.err (!%p378_p9)
}
 0x137   :  { %333 = dma.vmem_to_hbm [thread:$0]  %s331_s19, 256, %s726_s1, [#allocation4]  }
 0x138   :  { %392 = dma.done.wait [#allocation4], 256  }
 0x139   :  { %393 = vsyncadd [#allocation4], 4294967040 }
 0x13a   :  { %337 = vsyncpa [#allocation3], 1 }
 0x13b   :  { %338 = vsyncpa [#allocation4], 1 }

</bundles_post_ra>
